<compile_context>
chip_gen: v5e
topology: v5e:2x2
jax: 0.10.0
libtpu: 0.0.40
codegen_flags: <defaults>
</compile_context>

<pallas_src>
import jax
import jax.numpy as jnp
from jax.experimental import pallas as pl
from jax.experimental.pallas import tpu as pltpu

NEG_SLOPE = 0.01   # PyTorch default negative_slope for LeakyReLU
LANES = 128        # lane-padded feature width used inside the kernel

# Row offsets of each parameter inside the packed (SLAB_ROWS, 128) slab.
# Every region starts on an 8-row (sublane-tile) boundary.
_W1_OFF, _W1_ROWS = 0, 6        # (6, 100)  -> rows 0:6   (region 0:8)
_B1_OFF = 8                     # (1, 100)  -> row  8     (region 8:16)
_W2_OFF, _W2_ROWS = 16, 128     # (100, 50) -> rows 16:144 (zero-padded to 128 rows)
_B2_OFF = 144                   # (1, 50)   -> row  144   (region 144:152)
_W3_OFF, _W3_ROWS = 152, 128    # (50, 6)   -> rows 152:280 (zero-padded to 128 rows)
_B3_OFF = 280                   # (1, 6)    -> row  280   (region 280:288)
SLAB_ROWS = 288


def _leaky_relu(x):
    return jnp.where(x > 0, x, NEG_SLOPE * x)


def _round_up(n, m):
    return ((n + m - 1) // m) * m


def mlp_kernel(x_ref, p_ref, o_ref):
    x = x_ref[...]                                      # (TB, 6)

    w1 = p_ref[pl.ds(_W1_OFF, _W1_ROWS), :]             # (6, 128)   cols 100:128 zero
    b1 = p_ref[pl.ds(_B1_OFF, 1), :]                    # (1, 128)
    w2 = p_ref[pl.ds(_W2_OFF, _W2_ROWS), :]             # (128, 128) rows 100: / cols 50: zero
    b2 = p_ref[pl.ds(_B2_OFF, 1), :]                    # (1, 128)
    w3 = p_ref[pl.ds(_W3_OFF, _W3_ROWS), :]             # (128, 128) rows 50: / cols 6: zero
    b3 = p_ref[pl.ds(_B3_OFF, 1), :]                    # (1, 128)

    h1 = _leaky_relu(jnp.dot(x, w1, preferred_element_type=jnp.float32) + b1)   # (TB, 128)
    h2 = _leaky_relu(jnp.dot(h1, w2, preferred_element_type=jnp.float32) + b2)  # (TB, 128)
    h3 = jnp.dot(h2, w3, preferred_element_type=jnp.float32) + b3               # (TB, 128)
    o_ref[...] = h3.astype(o_ref.dtype)                 # lane-dense full store


def pack_params(params):
    """Pack w1,b1,w2,b2,w3,b3 into one zero-padded (SLAB_ROWS, 128) f32 slab."""
    def pad(a, rows):
        return jnp.pad(
            a.astype(jnp.float32),
            ((0, rows - a.shape[0]), (0, LANES - a.shape[1])),
        )

    slab = jnp.concatenate(
        [
            pad(params["w1"], 8),     # rows   0:8
            pad(params["b1"], 8),     # rows   8:16
            pad(params["w2"], 128),   # rows  16:144
            pad(params["b2"], 8),     # rows 144:152
            pad(params["w3"], 128),   # rows 152:280
            pad(params["b3"], 8),     # rows 280:288
        ],
        axis=0,
    )
    assert slab.shape == (SLAB_ROWS, LANES)
    return slab


def net_forward(x, params, *, tb=1024):
    """x: (B, 6) float32. params: dict of w1,b1,w2,b2,w3,b3. Returns (B, 6) f32."""
    x = x.astype(jnp.float32)
    B, in_dim = x.shape
    out_dim = params["w3"].shape[1]

    # Batch tile: multiple of 8 sublanes, capped so VMEM per step stays small
    # (x: TB*6*4 B, out: TB*128*4 B, doubled for pipelining -> << 32 MiB at TB=1024,
    #  safe under v7x's 64 MiB physical / 32 MiB scoped VMEM).
    TB = min(tb, _round_up(B, 8))
    B_pad = _round_up(B, TB)
    if B_pad != B:
        x = jnp.pad(x, ((0, B_pad - B), (0, 0)))

    slab = pack_params(params)

    out_padded = pl.pallas_call(
        mlp_kernel,
        out_shape=jax.ShapeDtypeStruct((B_pad, LANES), jnp.float32),
        grid=(B_pad // TB,),
        in_specs=[
            pl.BlockSpec((TB, in_dim), lambda i: (i, 0)),          # batch-tiled x
            pl.BlockSpec((SLAB_ROWS, LANES), lambda i: (0, 0)),    # weight-resident slab
        ],
        out_specs=pl.BlockSpec((TB, LANES), lambda i: (i, 0)),     # lane-dense output
        compiler_params=pltpu.CompilerParams(
            dimension_semantics=("parallel",),                     # megacore on v7x
        ),
    )(x, slab)

    return out_padded[:B, :out_dim]


def init_params(key):
    """Deterministic init mimicking nn.Linear's uniform(-1/sqrt(fan_in), +1/sqrt(fan_in))."""
    ks = jax.random.split(key, 6)

    def linear(kw, kb, fan_in, fan_out):
        bound = 1.0 / jnp.sqrt(jnp.float32(fan_in))
        w = jax.random.uniform(kw, (fan_in, fan_out), jnp.float32, -bound, bound)
        b = jax.random.uniform(kb, (1, fan_out), jnp.float32, -bound, bound)
        return w, b

    w1, b1 = linear(ks[0], ks[1], 6, 100)
    w2, b2 = linear(ks[2], ks[3], 100, 50)
    w3, b3 = linear(ks[4], ks[5], 50, 6)
    return {"w1": w1, "b1": b1, "w2": w2, "b2": b2, "w3": w3, "b3": b3}


def reference_forward(x, p):
    h1 = _leaky_relu(x @ p["w1"] + p["b1"])
    h2 = _leaky_relu(h1 @ p["w2"] + p["b2"])
    return h2 @ p["w3"] + p["b3"]


if __name__ == "__main__":
    key = jax.random.PRNGKey(0)
    kx, kp, kx2 = jax.random.split(key, 3)
    params = init_params(kp)

    # Small primary check (batch=8, features=6 as implied by the module).
    B = 8
    x = jax.random.normal(kx, (B, 6), dtype=jnp.float32)
    out = jax.block_until_ready(net_forward(x, params))
    ref = reference_forward(x, params)
    assert out.shape == (B, 6), out.shape
    assert jnp.allclose(out, ref, atol=1e-5, rtol=1e-5), "mismatch vs pure-JAX reference (B=8)"

    # Secondary check exercising the batch grid + padding path (grid > 1, B % TB != 0).
    B2 = 300
    x2 = jax.random.normal(kx2, (B2, 6), dtype=jnp.float32)
    out2 = jax.block_until_ready(net_forward(x2, params, tb=128))
    ref2 = reference_forward(x2, params)
    assert out2.shape == (B2, 6), out2.shape
    assert jnp.allclose(out2, ref2, atol=1e-5, rtol=1e-5), "mismatch vs pure-JAX reference (B=300)"

    print("KERNEL_OK")
</pallas_src>

<mosaic_0001>
module attributes {stable_mosaic.version = 11 : i64} {
  func.func @mlp_kernel(%arg0: i32, %arg1: memref<8x6xf32, #tpu.memory_space<vmem>>, %arg2: memref<288x128xf32, #tpu.memory_space<vmem>>, %arg3: memref<8x128xf32, #tpu.memory_space<vmem>>) attributes {dimension_semantics = [#tpu.dimension_semantics<parallel>], iteration_bounds = array<i64: 1>, scalar_prefetch = 0 : i64, scratch_operands = 0 : i64, tpu.core_type = #tpu.core_type<tc>, window_params = [{transform_indices = @transform_0, window_bounds = array<i64: 8, 6>}, {pipeline_mode = #tpu.pipeline_mode<synchronous>, transform_indices = @transform_1, window_bounds = array<i64: 288, 128>}, {transform_indices = @transform_2, window_bounds = array<i64: 8, 128>}]} {
    %c0 = arith.constant 0 : index
    %c0_0 = arith.constant 0 : index
    %0 = vector.load %arg1[%c0, %c0_0] : memref<8x6xf32, #tpu.memory_space<vmem>>, vector<8x6xf32>
    %c0_1 = arith.constant 0 : index
    %c0_2 = arith.constant 0 : index
    %1 = vector.load %arg2[%c0_1, %c0_2] : memref<288x128xf32, #tpu.memory_space<vmem>>, vector<6x128xf32>
    %c8 = arith.constant 8 : index
    %c0_3 = arith.constant 0 : index
    %2 = vector.load %arg2[%c8, %c0_3] : memref<288x128xf32, #tpu.memory_space<vmem>>, vector<1x128xf32>
    %c16 = arith.constant 16 : index
    %c0_4 = arith.constant 0 : index
    %3 = vector.load %arg2[%c16, %c0_4] : memref<288x128xf32, #tpu.memory_space<vmem>>, vector<128x128xf32>
    %c144 = arith.constant 144 : index
    %c0_5 = arith.constant 0 : index
    %4 = vector.load %arg2[%c144, %c0_5] : memref<288x128xf32, #tpu.memory_space<vmem>>, vector<1x128xf32>
    %c152 = arith.constant 152 : index
    %c0_6 = arith.constant 0 : index
    %5 = vector.load %arg2[%c152, %c0_6] : memref<288x128xf32, #tpu.memory_space<vmem>>, vector<128x128xf32>
    %c280 = arith.constant 280 : index
    %c0_7 = arith.constant 0 : index
    %6 = vector.load %arg2[%c280, %c0_7] : memref<288x128xf32, #tpu.memory_space<vmem>>, vector<1x128xf32>
    %cst = arith.constant dense<0.000000e+00> : vector<8x128xf32>
    %7 = tpu.matmul %0, %1, %cst {dimension_numbers = #tpu.dot_dimension_numbers<[1], [0], [0], [1], [0, 0, 1, 1], [], []>} : vector<8x6xf32>, vector<6x128xf32>, vector<8x128xf32> -> vector<8x128xf32>
    %8 = vector.broadcast %2 : vector<1x128xf32> to vector<8x128xf32>
    %9 = arith.addf %7, %8 : vector<8x128xf32>
    %cst_8 = arith.constant 0.000000e+00 : f32
    %10 = vector.broadcast %cst_8 : f32 to vector<8x128xf32>
    %11 = arith.cmpf ogt, %9, %10 : vector<8x128xf32>
    %cst_9 = arith.constant 0.00999999977 : f32
    %12 = vector.broadcast %cst_9 : f32 to vector<8x128xf32>
    %13 = arith.mulf %12, %9 : vector<8x128xf32>
    %14 = arith.select %11, %9, %13 : vector<8x128xi1>, vector<8x128xf32>
    %cst_10 = arith.constant dense<0.000000e+00> : vector<8x128xf32>
    %15 = tpu.matmul %14, %3, %cst_10 {dimension_numbers = #tpu.dot_dimension_numbers<[1], [0], [0], [1], [0, 0, 1, 1], [], []>} : vector<8x128xf32>, vector<128x128xf32>, vector<8x128xf32> -> vector<8x128xf32>
    %16 = vector.broadcast %4 : vector<1x128xf32> to vector<8x128xf32>
    %17 = arith.addf %15, %16 : vector<8x128xf32>
    %cst_11 = arith.constant 0.000000e+00 : f32
    %18 = vector.broadcast %cst_11 : f32 to vector<8x128xf32>
    %19 = arith.cmpf ogt, %17, %18 : vector<8x128xf32>
    %cst_12 = arith.constant 0.00999999977 : f32
    %20 = vector.broadcast %cst_12 : f32 to vector<8x128xf32>
    %21 = arith.mulf %20, %17 : vector<8x128xf32>
    %22 = arith.select %19, %17, %21 : vector<8x128xi1>, vector<8x128xf32>
    %cst_13 = arith.constant dense<0.000000e+00> : vector<8x128xf32>
    %23 = tpu.matmul %22, %5, %cst_13 {dimension_numbers = #tpu.dot_dimension_numbers<[1], [0], [0], [1], [0, 0, 1, 1], [], []>} : vector<8x128xf32>, vector<128x128xf32>, vector<8x128xf32> -> vector<8x128xf32>
    %24 = vector.broadcast %6 : vector<1x128xf32> to vector<8x128xf32>
    %25 = arith.addf %23, %24 : vector<8x128xf32>
    %c0_14 = arith.constant 0 : index
    %c0_15 = arith.constant 0 : index
    %26 = vector.load %arg3[%c0_14, %c0_15] : memref<8x128xf32, #tpu.memory_space<vmem>>, vector<8x128xf32>
    tpu.vector_store %arg3[%c0_14, %c0_15], %25 {strides = array<i32>} : memref<8x128xf32, #tpu.memory_space<vmem>>, vector<8x128xf32>,
    return
  }
  func.func @transform_0(%arg0: i32) -> (i32, i32) {
    %c0_i32 = arith.constant 0 : i32
    %c0_i32_0 = arith.constant 0 : i32
    return %arg0, %c0_i32 : i32, i32
  }
  func.func @transform_1(%arg0: i32) -> (i32, i32) {
    %c0_i32 = arith.constant 0 : i32
    %c0_i32_0 = arith.constant 0 : i32
    %c0_i32_1 = arith.constant 0 : i32
    return %c0_i32, %c0_i32_0 : i32, i32
  }
  func.func @transform_2(%arg0: i32) -> (i32, i32) {
    %c0_i32 = arith.constant 0 : i32
    %c0_i32_0 = arith.constant 0 : i32
    return %arg0, %c0_i32 : i32, i32
  }
}

</mosaic_0001>

<bundles_post_ra>
// kernel: tpu_custom_call.1
= control target key start
LH: loop header
LB: loop body
LE: loop exit
PB: predicated region body
PF: predicated region fallthrough
CT: control target
= control target key end

     0   :  { %7 = vsyncpa [#allocation3], 0  ;;  %s292_s0 = inlined_call_operand.hbm [shape: f32[8,6], index: 0, kind: input, shape index: {}]   ;;  %s293_s1 = inlined_call_operand.hbm [shape: f32[288,128], index: 1, kind: input, shape index: {}]   ;;  %s294_s2 = inlined_call_operand.hbm [shape: f32[8,128], index: 2, kind: output, shape index: {}]  }
   0x1   :  { %8 = vsyncpa [#allocation6], 0 }
   0x2   :  { %9 = vsyncpa [#allocation4], 0  ;;  %s15_s11 = sshll.u32 %s292_s0, 4  ;;  %s263_s12 = smov [#allocation2]   ;;  %s16_s11 = int_to_ptr.hbm [resolvable:$true] %s15_s11 }
   0x3   :  { %s17_s13 = sshll.u32 %s263_s12, 4  ;;  %s25_s16 = sshll.u32 %s293_s1, 4  ;;  %s18_s13 = int_to_ptr.vmem [resolvable:$true] %s17_s13  ;;  %s26_s16 = int_to_ptr.hbm [resolvable:$true] %s25_s16 }
   0x4   :  { %20 = dma.hbm_to_vmem [thread:$0]  %s16_s11, 128, %s18_s13, [#allocation3]  }
   0x5   :  { %s264_s17 = smov [#allocation5]   ;;  %s265_s19 = smov 128  }
   0x6   :  { %s27_s18 = sshll.u32 %s264_s17, 4  ;;  %s266_s20 = smov 8   ;;  %s28_s18 = int_to_ptr.vmem [resolvable:$true] %s27_s18 }
   0x7   :  { %33 = dma.hbm_to_vmem [thread:$0]  %s26_s16, 4608, %s28_s18, [#allocation6], %s265_s19, %s265_s19, %s266_s20  }
   0x8   :  { %257 = dma.done.wait [#allocation3], 128  }
   0x9   :  { %258 = vsyncadd [#allocation3], 4294967168 }
   0xa   :  { %259 = dma.done.wait [#allocation6], 4608  }
   0xb   :  { %260 = vsyncadd [#allocation6], 4294962688  ;;  %vm84_vm0 = vcmask 1045504   ;;  %vm80_vm1 = vcmask 48128   ;;  %v43_v0 = vld [vmem:[#allocation5] sm:$0x3f] }
   0xc   :  { %v42_v1 = vld [vmem:[#allocation2] sm:$0xff]  ;;  %v60_v2 = vld [vmem:[#allocation5 + $0x88] sm:$0xff]  ;;  %175 = vmatpush.msk.msra.mxu0 %vm84_vm0, %v43_v0  ;;  %v59_v3 = vld [vmem:[#allocation5 + $0x80] sm:$0xff]  ;;  %s267_s0 = smov [#allocation7]   ;;  %s164_s23 = sshll.u32 %s294_s2, 4  ;;  %s165_s23 = int_to_ptr.hbm [resolvable:$true] %s164_s23 }
   0xd   :  { %112 = vmatpush.msra.mxu1 %v60_v2  ;;  %176 = vmatmul.msk.f32.vlgmr.msra.gmra.mxu0 %vm80_vm1, %v42_v1  ;;  %v58_v4 = vld [vmem:[#allocation5 + $0x78] sm:$0xff]  ;;  %v57_v5 = vld [vmem:[#allocation5 + $0x70] sm:$0xff]  ;;  %v56_v6 = vld [vmem:[#allocation5 + $0x68] sm:$0xff]  ;;  %s162_s1 = sshll.u32 %s267_s0, 4  ;;  %s163_s1 = int_to_ptr.vmem [resolvable:$true] %s162_s1 }
   0xe   :  { %v55_v7 = vld [vmem:[#allocation5 + $0x60] sm:$0xff]  ;;  %v54_v8 = vld [vmem:[#allocation5 + $0x58] sm:$0xff]  ;;  %v53_v9 = vld [vmem:[#allocation5 + $0x50] sm:$0xff] }
   0xf   :  { %113 = vmatpush.msra.mxu1 %v59_v3  ;;  %v52_v10 = vld [vmem:[#allocation5 + $0x48] sm:$0xff]  ;;  %v51_v11 = vld [vmem:[#allocation5 + $0x40] sm:$0xff]  ;;  %v50_v12 = vld [vmem:[#allocation5 + $0x38] sm:$0xff] }
  0x10   :  { %v49_v13 = vld [vmem:[#allocation5 + $0x30] sm:$0xff]  ;;  %v48_v14 = vld [vmem:[#allocation5 + $0x28] sm:$0xff]  ;;  %v47_v15 = vld [vmem:[#allocation5 + $0x20] sm:$0xff] }
  0x11   :  { %114 = vmatpush.msra.mxu1 %v58_v4  ;;  %v46_v16 = vld [vmem:[#allocation5 + $0x18] sm:$0xff]  ;;  %v45_v17 = vld [vmem:[#allocation5 + $0x10] sm:$0xff]  ;;  %v76_v19 = vld [vmem:[#allocation5 + $0x108] sm:$0xff] }
  0x12   :  { %v77_v18 = vld [vmem:[#allocation5 + $0x110] sm:$0xff]  ;;  %v75_v20 = vld [vmem:[#allocation5 + $0x100] sm:$0xff]  ;;  %v74_v21 = vld [vmem:[#allocation5 + $0xf8] sm:$0xff] }
  0x13   :  { %115 = vmatpush.msra.mxu1 %v57_v5  ;;  %136 = vmatpush.msra.mxu2 %v77_v18  ;;  %v73_v22 = vld [vmem:[#allocation5 + $0xf0] sm:$0xff]  ;;  %v72_v23 = vld [vmem:[#allocation5 + $0xe8] sm:$0xff]  ;;  %v71_v24 = vld [vmem:[#allocation5 + $0xe0] sm:$0xff] }
  0x14   :  { %v70_v25 = vld [vmem:[#allocation5 + $0xd8] sm:$0xff]  ;;  %v69_v26 = vld [vmem:[#allocation5 + $0xd0] sm:$0xff]  ;;  %v68_v27 = vld [vmem:[#allocation5 + $0xc8] sm:$0xff] }
  0x15   :  { %116 = vmatpush.msra.mxu1 %v56_v6  ;;  %137 = vmatpush.msra.mxu2 %v76_v19  ;;  %v67_v28 = vld [vmem:[#allocation5 + $0xc0] sm:$0xff]  ;;  %v66_v29 = vld [vmem:[#allocation5 + $0xb8] sm:$0xff]  ;;  %v65_v30 = vld [vmem:[#allocation5 + $0xb0] sm:$0xff] }
  0x16   :  { %v182_v31 = vld [vmem:[#allocation5 + $0x8] ss:$0 sm:$0xff]  ;;  %v63_v37 = vld [vmem:[#allocation5 + $0xa0] sm:$0xff]  ;;  %v62_v38 = vld [vmem:[#allocation5 + $0x98] sm:$0xff] }
  0x17   :  { %117 = vmatpush.msra.mxu1 %v55_v7  ;;  %138 = vmatpush.msra.mxu2 %v75_v20  ;;  %v64_v36 = vld [vmem:[#allocation5 + $0xa8] sm:$0xff]  ;;  %v183_v39 = vld [vmem:[#allocation5 + $0x90] ss:$0 sm:$0xff]  ;;  %v184_v44 = vld [vmem:[#allocation5 + $0x118] ss:$0 sm:$0xff] }
  0x19   :  { %118 = vmatpush.msra.mxu1 %v54_v8  ;;  %139 = vmatpush.msra.mxu2 %v74_v21 }
  0x1b   :  { %119 = vmatpush.msra.mxu1 %v53_v9  ;;  %140 = vmatpush.msra.mxu2 %v73_v22 }
  0x1d   :  { %120 = vmatpush.msra.mxu1 %v52_v10  ;;  %141 = vmatpush.msra.mxu2 %v72_v23 }
  0x1f   :  { %121 = vmatpush.msra.mxu1 %v51_v11  ;;  %142 = vmatpush.msra.mxu2 %v71_v24 }
  0x21   :  { %122 = vmatpush.msra.mxu1 %v50_v12  ;;  %143 = vmatpush.msra.mxu2 %v70_v25 }
  0x23   :  { %123 = vmatpush.msra.mxu1 %v49_v13  ;;  %144 = vmatpush.msra.mxu2 %v69_v26 }
  0x25   :  { %124 = vmatpush.msra.mxu1 %v48_v14  ;;  %145 = vmatpush.msra.mxu2 %v68_v27 }
  0x27   :  { %125 = vmatpush.msra.mxu1 %v47_v15  ;;  %146 = vmatpush.msra.mxu2 %v67_v28 }
  0x29   :  { %126 = vmatpush.msra.mxu1 %v46_v16  ;;  %147 = vmatpush.msra.mxu2 %v66_v29 }
  0x2b   :  { %127 = vmatpush.msra.mxu1 %v45_v17  ;;  %148 = vmatpush.msra.mxu2 %v65_v30 }
  0x2d   :  { %149 = vmatpush.msra.mxu2 %v64_v36 }
  0x2f   :  { %150 = vmatpush.msra.mxu2 %v63_v37 }
  0x31   :  { %151 = vmatpush.msra.mxu2 %v62_v38 }
  0x8a   :  { %v105_v32 = vpop.f32.mrf.mxu0 }
  0x8b   :  { %v106_v33 = vadd.f32 %v182_v31, %v105_v32 }
  0x8d   :  { %vm108_vm2 = vcmp.gt.f32.partialorder %v106_v33, 0.0  ;;  %v109_v34 = vmul.f32 0.01, %v106_v33 }
  0x8f   :  { %v110_v35 = vsel %vm108_vm2, %v106_v33, %v109_v34 }
  0x90   :  { %128 = vmatmul.f32.vlgmr.msra.gmra.mxu1 %v110_v35 }
 0x10d   :  { %v129_v40 = vpop.f32.mrf.mxu1 }
 0x10e   :  { %v130_v41 = vadd.f32 %v183_v39, %v129_v40 }
 0x110   :  { %vm132_vm3 = vcmp.gt.f32.partialorder %v130_v41, 0.0  ;;  %v133_v42 = vmul.f32 0.01, %v130_v41 }
 0x112   :  { %v134_v43 = vsel %vm132_vm3, %v130_v41, %v133_v42 }
 0x113   :  { %152 = vmatmul.f32.vlgmr.msra.gmra.mxu2 %v134_v43 }
 0x196   :  { %v153_v45 = vpop.f32.mrf.mxu2 }
 0x197   :  { %v154_v46 = vadd.f32 %v184_v44, %v153_v45 }
 0x199   :  { %156 = vst [vmem:[#allocation7] sm:$0xff] %v154_v46 }
 0x19a   :  { %167 = dma.vmem_to_hbm [thread:$0]  %s163_s1, 128, %s165_s23, [#allocation4]  }
 0x19b   :  { %261 = dma.done.wait [#allocation4], 128  }
 0x19c   :  { %262 = vsyncadd [#allocation4], 4294967168 }
 0x19d   :  { %172 = vsyncpa [#allocation3], 1 }
 0x19e   :  { %173 = vsyncpa [#allocation6], 1 }
 0x19f   :  { %174 = vsyncpa [#allocation4], 1 }

</bundles_post_ra>
